<compile_context>
chip_gen: v7x
topology: tpu7x:2x2x1
jax: 0.10.0
libtpu: 0.0.40
codegen_flags: <defaults>
</compile_context>

<pallas_src>
import functools

import jax
import jax.numpy as jnp
from jax.experimental import pallas as pl
from jax.experimental.pallas import tpu as pltpu

NEG_SLOPE = 0.01   # F.leaky_relu default
BN_EPS = 1e-5      # nn.BatchNorm1d default
LANE = 128         # TPU lane width; pad minor dims to multiples of this


def _leaky_relu(v):
    # For slope < 1: max(v, slope*v) == leaky_relu(v).
    return jnp.maximum(v, NEG_SLOPE * v)


def _round_up(n, m):
    return ((n + m - 1) // m) * m


def nn1_kernel(x_ref, bn_scale_ref, bn_shift_ref,
               w_in_ref, b_in_ref, w_h1_ref, b_h1_ref, w_out_ref, b_out_ref,
               o_ref):
    compute_dtype = w_in_ref.dtype  # bf16 by default, f32 if requested

    # BatchNorm1d (eval mode) folded into a per-feature affine, done in f32.
    h = x_ref[...] * bn_scale_ref[...] + bn_shift_ref[...]

    # layer_In + leaky_relu   (dropout is identity at inference)
    h = _leaky_relu(
        jnp.dot(h.astype(compute_dtype), w_in_ref[...],
                preferred_element_type=jnp.float32) + b_in_ref[...])

    # layer_h1 + leaky_relu
    h = _leaky_relu(
        jnp.dot(h.astype(compute_dtype), w_h1_ref[...],
                preferred_element_type=jnp.float32) + b_h1_ref[...])

    # layer_Out + leaky_relu (output columns are lane-padded to 128)
    h = _leaky_relu(
        jnp.dot(h.astype(compute_dtype), w_out_ref[...],
                preferred_element_type=jnp.float32) + b_out_ref[...])

    o_ref[...] = h.astype(o_ref.dtype)


@functools.partial(jax.jit, static_argnames=("block_b", "compute_dtype"))
def nn1_forward(x, params, block_b=512, compute_dtype=jnp.bfloat16):
    B, F = x.shape
    H = params["w_in"].shape[1]
    O = params["w_out"].shape[1]

    f32 = jnp.float32
    Fp = _round_up(F, LANE)
    Hp = _round_up(H, LANE)
    Op = _round_up(O, LANE)

    # Batch tile: big enough to fill the MXU M dim and amortize grid-step
    # overhead, never larger than the (8-rounded) batch, always a multiple of 8.
    bb = max(8, min(block_b, _round_up(B, 8)))
    grid = (pl.cdiv(B, bb),)

    # Fold BN running stats + affine into a per-feature scale/shift (glue).
    scale = params["bn_gamma"] * jax.lax.rsqrt(params["bn_running_var"] + BN_EPS)
    shift = params["bn_beta"] - params["bn_running_mean"] * scale

    # Zero-pad all lane dims to multiples of 128: padded features get
    # scale=shift=0, padded weight rows/cols are 0, padded biases are 0, and
    # leaky_relu(0) == 0, so padding is exact.
    x_p = jnp.pad(x.astype(f32), ((0, 0), (0, Fp - F)))
    scale_p = jnp.pad(scale.astype(f32), (0, Fp - F)).reshape(1, Fp)
    shift_p = jnp.pad(shift.astype(f32), (0, Fp - F)).reshape(1, Fp)

    w_in = jnp.pad(params["w_in"], ((0, Fp - F), (0, Hp - H))).astype(compute_dtype)
    b_in = jnp.pad(params["b_in"].reshape(1, H).astype(f32), ((0, 0), (0, Hp - H)))
    w_h1 = jnp.pad(params["w_h1"], ((0, Hp - H), (0, Hp - H))).astype(compute_dtype)
    b_h1 = jnp.pad(params["b_h1"].reshape(1, H).astype(f32), ((0, 0), (0, Hp - H)))
    w_out = jnp.pad(params["w_out"], ((0, Hp - H), (0, Op - O))).astype(compute_dtype)
    b_out = jnp.pad(params["b_out"].reshape(1, O).astype(f32), ((0, 0), (0, Op - O)))

    # VMEM budget estimate: single-buffered weights/vectors + double-buffered
    # activation tiles; keep the explicit limit <= 64 MiB so it is valid on v7x.
    wbytes = jnp.dtype(compute_dtype).itemsize
    weight_bytes = (w_in.size + w_h1.size + w_out.size) * wbytes
    vec_bytes = (scale_p.size + shift_p.size + b_in.size + b_h1.size + b_out.size) * 4
    act_bytes = 2 * bb * (Fp + Op) * 4
    vmem_limit = int(min(64 << 20, max(32 << 20,
                                       2 * (weight_bytes + vec_bytes + act_bytes))))

    cost = pl.CostEstimate(
        flops=2 * B * (Fp * Hp + Hp * Hp + Hp * Op),
        transcendentals=0,
        bytes_accessed=x_p.size * 4 + B * Op * 4 + weight_bytes + vec_bytes)

    def const_spec(shape):
        # Grid-invariant operand: fetched once; single-buffer to save VMEM.
        return pl.BlockSpec(shape, lambda i: (0, 0),
                            pipeline_mode=pl.Buffered(1))

    out_padded = pl.pallas_call(
        nn1_kernel,
        out_shape=jax.ShapeDtypeStruct((B, Op), f32),
        grid=grid,
        in_specs=[
            pl.BlockSpec((bb, Fp), lambda i: (i, 0)),   # x, tiled on batch
            const_spec((1, Fp)),                        # bn scale (f32)
            const_spec((1, Fp)),                        # bn shift (f32)
            const_spec((Fp, Hp)),                       # W_in (in, out) bf16
            const_spec((1, Hp)),                        # b_in (f32)
            const_spec((Hp, Hp)),                       # W_h1 bf16
            const_spec((1, Hp)),                        # b_h1 (f32)
            const_spec((Hp, Op)),                       # W_out bf16, lane-padded
            const_spec((1, Op)),                        # b_out (f32), lane-padded
        ],
        out_specs=pl.BlockSpec((bb, Op), lambda i: (i, 0)),
        compiler_params=pltpu.CompilerParams(
            dimension_semantics=("parallel",),
            vmem_limit_bytes=vmem_limit),
        cost_estimate=cost,
    )(x_p, scale_p, shift_p, w_in, b_in, w_h1, b_h1, w_out, b_out)

    # Strip the lane padding on the 2-wide logits outside the kernel.
    return out_padded[:, :O]


def init_params(key, features):
    """Deterministic synthetic parameters matching NN_1.__init__ shapes."""
    hidden = round(2.0 * features)
    ks = jax.random.split(key, 8)

    def lin(kw, kb, fan_in, fan_out):
        # PyTorch Linear stores (out, in); we keep (in, out) for x @ W.
        bound = 1.0 / jnp.sqrt(fan_in)
        w = jax.random.uniform(kw, (fan_in, fan_out), jnp.float32, -bound, bound)
        b = jax.random.uniform(kb, (1, fan_out), jnp.float32, -bound, bound)
        return w, b

    w_in, b_in = lin(ks[0], ks[1], features, hidden)
    w_h1, b_h1 = lin(ks[2], ks[3], hidden, hidden)
    # layer_h2 exists in __init__ but is unused in forward(); skipped.
    w_out, b_out = lin(ks[4], ks[5], hidden, 2)

    return {
        "bn_gamma": jnp.ones((features,), jnp.float32),
        "bn_beta": jnp.zeros((features,), jnp.float32),
        "bn_running_mean": jnp.zeros((features,), jnp.float32),
        "bn_running_var": jnp.ones((features,), jnp.float32),
        "w_in": w_in, "b_in": b_in,
        "w_h1": w_h1, "b_h1": b_h1,
        "w_out": w_out, "b_out": b_out,
    }


def reference_forward(x, params):
    """Plain-JAX f32 reference of the same eval-mode forward."""
    scale = params["bn_gamma"] / jnp.sqrt(params["bn_running_var"] + BN_EPS)
    h = (x - params["bn_running_mean"]) * scale + params["bn_beta"]
    h = _leaky_relu(h @ params["w_in"] + params["b_in"])
    h = _leaky_relu(h @ params["w_h1"] + params["b_h1"])
    h = _leaky_relu(h @ params["w_out"] + params["b_out"])
    return h


def matched_reference(x, params, compute_dtype=jnp.bfloat16):
    """Reference using the same bf16-weight / f32-accumulate recipe as the kernel."""
    scale = params["bn_gamma"] * jax.lax.rsqrt(params["bn_running_var"] + BN_EPS)
    shift = params["bn_beta"] - params["bn_running_mean"] * scale
    h = x.astype(jnp.float32) * scale + shift

    def layer(h, w, b):
        return _leaky_relu(
            jnp.dot(h.astype(compute_dtype), w.astype(compute_dtype),
                    preferred_element_type=jnp.float32) + b)

    h = layer(h, params["w_in"], params["b_in"])
    h = layer(h, params["w_h1"], params["b_h1"])
    h = layer(h, params["w_out"], params["b_out"])
    return h


if __name__ == "__main__":
    features = 16
    batch = 8

    key = jax.random.PRNGKey(0)
    k_x, k_p = jax.random.split(key)
    x = jax.random.normal(k_x, (batch, features), jnp.float32)
    params = init_params(k_p, features)

    out = nn1_forward(x, params)
    out = jax.block_until_ready(out)
    assert out.shape == (batch, 2)

    ref_matched = matched_reference(x, params)
    assert jnp.allclose(out, ref_matched, atol=2e-3, rtol=2e-3), \
        "mismatch vs matched-precision (bf16 matmul) reference"

    ref_f32 = reference_forward(x, params)
    assert jnp.allclose(out, ref_f32, atol=6e-2, rtol=6e-2), \
        "mismatch vs f32 reference"

    print("KERNEL_OK")
</pallas_src>

<mosaic_0001>
module attributes {stable_mosaic.version = 11 : i64} {
  func.func @nn1_kernel(%arg0: i32, %arg1: memref<8x128xf32, #tpu.memory_space<vmem>>, %arg2: memref<1x128xf32, #tpu.memory_space<vmem>>, %arg3: memref<1x128xf32, #tpu.memory_space<vmem>>, %arg4: memref<128x128xbf16, #tpu.memory_space<vmem>>, %arg5: memref<1x128xf32, #tpu.memory_space<vmem>>, %arg6: memref<128x128xbf16, #tpu.memory_space<vmem>>, %arg7: memref<1x128xf32, #tpu.memory_space<vmem>>, %arg8: memref<128x128xbf16, #tpu.memory_space<vmem>>, %arg9: memref<1x128xf32, #tpu.memory_space<vmem>>, %arg10: memref<8x128xf32, #tpu.memory_space<vmem>>) attributes {dimension_semantics = [#tpu.dimension_semantics<parallel>], iteration_bounds = array<i64: 1>, scalar_prefetch = 0 : i64, scratch_operands = 0 : i64, tpu.core_type = #tpu.core_type<tc>, window_params = [{transform_indices = @transform_0, window_bounds = array<i64: 8, 128>}, {pipeline_mode = #tpu.pipeline_mode<synchronous>, transform_indices = @transform_1, window_bounds = array<i64: 1, 128>}, {pipeline_mode = #tpu.pipeline_mode<synchronous>, transform_indices = @transform_2, window_bounds = array<i64: 1, 128>}, {pipeline_mode = #tpu.pipeline_mode<synchronous>, transform_indices = @transform_3, window_bounds = array<i64: 128, 128>}, {pipeline_mode = #tpu.pipeline_mode<synchronous>, transform_indices = @transform_4, window_bounds = array<i64: 1, 128>}, {pipeline_mode = #tpu.pipeline_mode<synchronous>, transform_indices = @transform_5, window_bounds = array<i64: 128, 128>}, {pipeline_mode = #tpu.pipeline_mode<synchronous>, transform_indices = @transform_6, window_bounds = array<i64: 1, 128>}, {pipeline_mode = #tpu.pipeline_mode<synchronous>, transform_indices = @transform_7, window_bounds = array<i64: 128, 128>}, {pipeline_mode = #tpu.pipeline_mode<synchronous>, transform_indices = @transform_8, window_bounds = array<i64: 1, 128>}, {transform_indices = @transform_9, window_bounds = array<i64: 8, 128>}]} {
    %c0 = arith.constant 0 : index
    %c0_0 = arith.constant 0 : index
    %0 = vector.load %arg1[%c0, %c0_0] : memref<8x128xf32, #tpu.memory_space<vmem>>, vector<8x128xf32>
    %c0_1 = arith.constant 0 : index
    %c0_2 = arith.constant 0 : index
    %1 = vector.load %arg2[%c0_1, %c0_2] : memref<1x128xf32, #tpu.memory_space<vmem>>, vector<1x128xf32>
    %2 = vector.broadcast %1 : vector<1x128xf32> to vector<8x128xf32>
    %3 = arith.mulf %0, %2 : vector<8x128xf32>
    %c0_3 = arith.constant 0 : index
    %c0_4 = arith.constant 0 : index
    %4 = vector.load %arg3[%c0_3, %c0_4] : memref<1x128xf32, #tpu.memory_space<vmem>>, vector<1x128xf32>
    %5 = vector.broadcast %4 : vector<1x128xf32> to vector<8x128xf32>
    %6 = arith.addf %3, %5 : vector<8x128xf32>
    %7 = arith.truncf %6 : vector<8x128xf32> to vector<8x128xbf16>
    %c0_5 = arith.constant 0 : index
    %c0_6 = arith.constant 0 : index
    %8 = vector.load %arg4[%c0_5, %c0_6] : memref<128x128xbf16, #tpu.memory_space<vmem>>, vector<128x128xbf16>
    %cst = arith.constant dense<0.000000e+00> : vector<8x128xf32>
    %9 = tpu.matmul %7, %8, %cst {dimension_numbers = #tpu.dot_dimension_numbers<[1], [0], [0], [1], [0, 0, 1, 1], [], []>} : vector<8x128xbf16>, vector<128x128xbf16>, vector<8x128xf32> -> vector<8x128xf32>
    %c0_7 = arith.constant 0 : index
    %c0_8 = arith.constant 0 : index
    %10 = vector.load %arg5[%c0_7, %c0_8] : memref<1x128xf32, #tpu.memory_space<vmem>>, vector<1x128xf32>
    %11 = vector.broadcast %10 : vector<1x128xf32> to vector<8x128xf32>
    %12 = arith.addf %9, %11 : vector<8x128xf32>
    %cst_9 = arith.constant 0.00999999977 : f32
    %13 = vector.broadcast %cst_9 : f32 to vector<8x128xf32>
    %14 = arith.mulf %13, %12 : vector<8x128xf32>
    %15 = arith.maximumf %12, %14 : vector<8x128xf32>
    %16 = arith.truncf %15 : vector<8x128xf32> to vector<8x128xbf16>
    %c0_10 = arith.constant 0 : index
    %c0_11 = arith.constant 0 : index
    %17 = vector.load %arg6[%c0_10, %c0_11] : memref<128x128xbf16, #tpu.memory_space<vmem>>, vector<128x128xbf16>
    %cst_12 = arith.constant dense<0.000000e+00> : vector<8x128xf32>
    %18 = tpu.matmul %16, %17, %cst_12 {dimension_numbers = #tpu.dot_dimension_numbers<[1], [0], [0], [1], [0, 0, 1, 1], [], []>} : vector<8x128xbf16>, vector<128x128xbf16>, vector<8x128xf32> -> vector<8x128xf32>
    %c0_13 = arith.constant 0 : index
    %c0_14 = arith.constant 0 : index
    %19 = vector.load %arg7[%c0_13, %c0_14] : memref<1x128xf32, #tpu.memory_space<vmem>>, vector<1x128xf32>
    %20 = vector.broadcast %19 : vector<1x128xf32> to vector<8x128xf32>
    %21 = arith.addf %18, %20 : vector<8x128xf32>
    %cst_15 = arith.constant 0.00999999977 : f32
    %22 = vector.broadcast %cst_15 : f32 to vector<8x128xf32>
    %23 = arith.mulf %22, %21 : vector<8x128xf32>
    %24 = arith.maximumf %21, %23 : vector<8x128xf32>
    %25 = arith.truncf %24 : vector<8x128xf32> to vector<8x128xbf16>
    %c0_16 = arith.constant 0 : index
    %c0_17 = arith.constant 0 : index
    %26 = vector.load %arg8[%c0_16, %c0_17] : memref<128x128xbf16, #tpu.memory_space<vmem>>, vector<128x128xbf16>
    %cst_18 = arith.constant dense<0.000000e+00> : vector<8x128xf32>
    %27 = tpu.matmul %25, %26, %cst_18 {dimension_numbers = #tpu.dot_dimension_numbers<[1], [0], [0], [1], [0, 0, 1, 1], [], []>} : vector<8x128xbf16>, vector<128x128xbf16>, vector<8x128xf32> -> vector<8x128xf32>
    %c0_19 = arith.constant 0 : index
    %c0_20 = arith.constant 0 : index
    %28 = vector.load %arg9[%c0_19, %c0_20] : memref<1x128xf32, #tpu.memory_space<vmem>>, vector<1x128xf32>
    %29 = vector.broadcast %28 : vector<1x128xf32> to vector<8x128xf32>
    %30 = arith.addf %27, %29 : vector<8x128xf32>
    %cst_21 = arith.constant 0.00999999977 : f32
    %31 = vector.broadcast %cst_21 : f32 to vector<8x128xf32>
    %32 = arith.mulf %31, %30 : vector<8x128xf32>
    %33 = arith.maximumf %30, %32 : vector<8x128xf32>
    %c0_22 = arith.constant 0 : index
    %c0_23 = arith.constant 0 : index
    %34 = vector.load %arg10[%c0_22, %c0_23] : memref<8x128xf32, #tpu.memory_space<vmem>>, vector<8x128xf32>
    tpu.vector_store %arg10[%c0_22, %c0_23], %33 {strides = array<i32>} : memref<8x128xf32, #tpu.memory_space<vmem>>, vector<8x128xf32>,
    return
  }
  func.func @transform_0(%arg0: i32) -> (i32, i32) {
    %c0_i32 = arith.constant 0 : i32
    %c0_i32_0 = arith.constant 0 : i32
    return %arg0, %c0_i32 : i32, i32
  }
  func.func @transform_1(%arg0: i32) -> (i32, i32) {
    %c0_i32 = arith.constant 0 : i32
    %c0_i32_0 = arith.constant 0 : i32
    %c0_i32_1 = arith.constant 0 : i32
    return %c0_i32, %c0_i32_0 : i32, i32
  }
  func.func @transform_2(%arg0: i32) -> (i32, i32) {
    %c0_i32 = arith.constant 0 : i32
    %c0_i32_0 = arith.constant 0 : i32
    %c0_i32_1 = arith.constant 0 : i32
    return %c0_i32, %c0_i32_0 : i32, i32
  }
  func.func @transform_3(%arg0: i32) -> (i32, i32) {
    %c0_i32 = arith.constant 0 : i32
    %c0_i32_0 = arith.constant 0 : i32
    %c0_i32_1 = arith.constant 0 : i32
    return %c0_i32, %c0_i32_0 : i32, i32
  }
  func.func @transform_4(%arg0: i32) -> (i32, i32) {
    %c0_i32 = arith.constant 0 : i32
    %c0_i32_0 = arith.constant 0 : i32
    %c0_i32_1 = arith.constant 0 : i32
    return %c0_i32, %c0_i32_0 : i32, i32
  }
  func.func @transform_5(%arg0: i32) -> (i32, i32) {
    %c0_i32 = arith.constant 0 : i32
    %c0_i32_0 = arith.constant 0 : i32
    %c0_i32_1 = arith.constant 0 : i32
    return %c0_i32, %c0_i32_0 : i32, i32
  }
  func.func @transform_6(%arg0: i32) -> (i32, i32) {
    %c0_i32 = arith.constant 0 : i32
    %c0_i32_0 = arith.constant 0 : i32
    %c0_i32_1 = arith.constant 0 : i32
    return %c0_i32, %c0_i32_0 : i32, i32
  }
  func.func @transform_7(%arg0: i32) -> (i32, i32) {
    %c0_i32 = arith.constant 0 : i32
    %c0_i32_0 = arith.constant 0 : i32
    %c0_i32_1 = arith.constant 0 : i32
    return %c0_i32, %c0_i32_0 : i32, i32
  }
  func.func @transform_8(%arg0: i32) -> (i32, i32) {
    %c0_i32 = arith.constant 0 : i32
    %c0_i32_0 = arith.constant 0 : i32
    %c0_i32_1 = arith.constant 0 : i32
    return %c0_i32, %c0_i32_0 : i32, i32
  }
  func.func @transform_9(%arg0: i32) -> (i32, i32) {
    %c0_i32 = arith.constant 0 : i32
    %c0_i32_0 = arith.constant 0 : i32
    return %arg0, %c0_i32 : i32, i32
  }
}

</mosaic_0001>

<bundles_post_ra>
// kernel: nn1_forward.1
= control target key start
LH: loop header
LB: loop body
LE: loop exit
PB: predicated region body
PF: predicated region fallthrough
CT: control target
= control target key end

     0   :  { %v539_v0 = vmov 0.0   ;;  %vm540_vm0 = vmmov 0   ;;  %s714_s3 = inlined_call_operand.vmem [shape: bf16[128,128], index: 3, kind: input, shape index: {}]   ;;  %s715_s5 = inlined_call_operand.vmem [shape: bf16[128,128], index: 5, kind: input, shape index: {}]   ;;  %s716_s0 = inlined_call_operand.vmem [shape: f32[8,128], index: 0, kind: input, shape index: {}]   ;;  %s717_s1 = inlined_call_operand.vmem [shape: f32[1,128], index: 1, kind: input, shape index: {}]   ;;  %s718_s2 = inlined_call_operand.vmem [shape: f32[1,128], index: 2, kind: input, shape index: {}]   ;;  %s719_s7 = inlined_call_operand.vmem [shape: bf16[128,128], index: 7, kind: input, shape index: {}]   ;;  %s720_s4 = inlined_call_operand.vmem [shape: f32[1,128], index: 4, kind: input, shape index: {}]   ;;  %s721_s6 = inlined_call_operand.vmem [shape: f32[1,128], index: 6, kind: input, shape index: {}]   ;;  %s722_s8 = inlined_call_operand.vmem [shape: f32[1,128], index: 8, kind: input, shape index: {}]   ;;  %s723_s9 = inlined_call_operand.vmem [shape: f32[8,128], index: 9, kind: output, shape index: {}]  }
   0x1   :  { %453 = vmatprep.subr.bf16.mxu0 %v539_v0  ;;  %v515_v1 = vld [vmem:[%s714_s3] sm:$0xff]   ;;  %469 = vmatprep.mubr.msk.bf16.mxu0 %vm540_vm0, %v539_v0  ;;  %v516_v2 = vld [vmem:[%s714_s3 + $0x8] sm:$0xff]   ;;  %v517_v3 = vld [vmem:[%s714_s3 + $0x10] sm:$0xff]  }
   0x2   :  { %473 = vmatprep.subr.bf16.mxu1 %v539_v0  ;;  %489 = vmatprep.mubr.msk.bf16.mxu1 %vm540_vm0, %v539_v0  ;;  %v523_v4 = vld [vmem:[%s715_s5] sm:$0xff]   ;;  %v518_v5 = vld [vmem:[%s714_s3 + $0x18] sm:$0xff]   ;;  %v524_v6 = vld [vmem:[%s715_s5 + $0x8] sm:$0xff]  }
   0x3   :  { %454 = vmatpush3.bf16.msra.mxu0 %v515_v1  ;;  %474 = vmatpush3.bf16.msra.mxu1 %v523_v4  ;;  %v519_v7 = vld [vmem:[%s714_s3 + $0x20] sm:$0xff]   ;;  %v525_v8 = vld [vmem:[%s715_s5 + $0x10] sm:$0xff]   ;;  %v520_v9 = vld [vmem:[%s714_s3 + $0x28] sm:$0xff]  }
   0x4   :  { %455 = vmatprep.subr.bf16.mxu0 %v539_v0  ;;  %475 = vmatprep.subr.bf16.mxu1 %v539_v0  ;;  %v33_v10 = vld [vmem:[%s716_s0] sm:$0xff]  ;;  %v526_v12 = vld [vmem:[%s715_s5 + $0x18] sm:$0xff]   ;;  %v521_v14 = vld [vmem:[%s714_s3 + $0x30] sm:$0xff]  }
   0x5   :  { %v397_v11 = vld [vmem:[%s717_s1] ss:$0 sm:$0xff]  ;;  %v522_v18 = vld [vmem:[%s714_s3 + $0x38] sm:$0xff]   ;;  %v528_v19 = vld [vmem:[%s715_s5 + $0x28] sm:$0xff]  }
   0x6   :  { %v41_v13 = vmul.f32 %v397_v11, %v33_v10  ;;  %v398_v15 = vld [vmem:[%s718_s2] ss:$0 sm:$0xff]  ;;  %v529_v21 = vld [vmem:[%s715_s5 + $0x30] sm:$0xff]   ;;  %v530_v22 = vld [vmem:[%s715_s5 + $0x38] sm:$0xff]  }
   0x7   :  { %456 = vmatpush3.bf16.msra.mxu0 %v516_v2  ;;  %476 = vmatpush3.bf16.msra.mxu1 %v524_v6  ;;  %v527_v16 = vld [vmem:[%s715_s5 + $0x20] sm:$0xff]   ;;  %v532_v24 = vld [vmem:[%s719_s7 + $0x8] sm:$0xff]   ;;  %v533_v25 = vld [vmem:[%s719_s7 + $0x10] sm:$0xff]  }
   0x8   :  { %457 = vmatprep.subr.bf16.mxu0 %v539_v0  ;;  %477 = vmatprep.subr.bf16.mxu1 %v539_v0  ;;  %v49_v17 = vadd.f32 %v398_v15, %v41_v13  ;;  %v531_v23 = vld [vmem:[%s719_s7] sm:$0xff]   ;;  %v534_v26 = vld [vmem:[%s719_s7 + $0x18] sm:$0xff]   ;;  %v536_v28 = vld [vmem:[%s719_s7 + $0x28] sm:$0xff]  }
   0x9   :  { %v535_v27 = vld [vmem:[%s719_s7 + $0x20] sm:$0xff]   ;;  %v537_v38 = vld [vmem:[%s719_s7 + $0x30] sm:$0xff]   ;;  %v538_v39 = vld [vmem:[%s719_s7 + $0x38] sm:$0xff]  }
   0xa   :  { %v50_v20 = vpack.c.bf16 %v49_v17, %v49_v17  ;;  %v399_v29 = vld [vmem:[%s720_s4] ss:$0 sm:$0xff] }
   0xb   :  { %458 = vmatpush3.bf16.msra.mxu0 %v517_v3  ;;  %478 = vmatpush3.bf16.msra.mxu1 %v525_v8  ;;  %v408_v40 = vld [vmem:[%s721_s6] ss:$0 sm:$0xff] }
   0xc   :  { %459 = vmatprep.subr.bf16.mxu0 %v539_v0  ;;  %479 = vmatprep.subr.bf16.mxu1 %v539_v0  ;;  %v417_v49 = vld [vmem:[%s722_s8] ss:$0 sm:$0xff] }
   0xf   :  { %460 = vmatpush3.bf16.msra.mxu0 %v518_v5  ;;  %480 = vmatpush3.bf16.msra.mxu1 %v526_v12 }
  0x10   :  { %461 = vmatprep.subr.bf16.mxu0 %v539_v0  ;;  %481 = vmatprep.subr.bf16.mxu1 %v539_v0 }
  0x13   :  { %462 = vmatpush3.bf16.msra.mxu0 %v519_v7  ;;  %482 = vmatpush3.bf16.msra.mxu1 %v527_v16 }
  0x14   :  { %463 = vmatprep.subr.bf16.mxu0 %v539_v0  ;;  %483 = vmatprep.subr.bf16.mxu1 %v539_v0 }
  0x17   :  { %464 = vmatpush3.bf16.msra.mxu0 %v520_v9  ;;  %484 = vmatpush3.bf16.msra.mxu1 %v528_v19 }
  0x18   :  { %465 = vmatprep.subr.bf16.mxu0 %v539_v0  ;;  %485 = vmatprep.subr.bf16.mxu1 %v539_v0 }
  0x1b   :  { %466 = vmatpush3.bf16.msra.mxu0 %v521_v14  ;;  %486 = vmatpush3.bf16.msra.mxu1 %v529_v21 }
  0x1c   :  { %467 = vmatprep.subr.bf16.mxu0 %v539_v0  ;;  %487 = vmatprep.subr.bf16.mxu1 %v539_v0 }
  0x1f   :  { %468 = vmatpush3.bf16.msra.mxu0 %v522_v18  ;;  %488 = vmatpush3.bf16.msra.mxu1 %v530_v22 }
  0x20   :  { %493 = vmatprep.subr.bf16.mxu0 %v539_v0 }
  0x22   :  { %470 = vmatmul.mubr.bf16.vlgmr.msra.gmra.mrb[0].mxu0 %v50_v20 }
  0x23   :  { %509 = vmatprep.mubr.msk.bf16.mxu0 %vm540_vm0, %v539_v0  ;;  %494 = vmatpush3.bf16.msra.mxu0 %v531_v23 }
  0x24   :  { %495 = vmatprep.subr.bf16.mxu0 %v539_v0 }
  0x27   :  { %496 = vmatpush3.bf16.msra.mxu0 %v532_v24 }
  0x28   :  { %497 = vmatprep.subr.bf16.mxu0 %v539_v0 }
  0x2b   :  { %498 = vmatpush3.bf16.msra.mxu0 %v533_v25 }
  0x2c   :  { %499 = vmatprep.subr.bf16.mxu0 %v539_v0 }
  0x2f   :  { %500 = vmatpush3.bf16.msra.mxu0 %v534_v26 }
  0x30   :  { %501 = vmatprep.subr.bf16.mxu0 %v539_v0 }
  0x33   :  { %502 = vmatpush3.bf16.msra.mxu0 %v535_v27 }
  0x34   :  { %503 = vmatprep.subr.bf16.mxu0 %v539_v0 }
  0x37   :  { %504 = vmatpush3.bf16.msra.mxu0 %v536_v28 }
  0x38   :  { %505 = vmatprep.subr.bf16.mxu0 %v539_v0 }
  0x3b   :  { %506 = vmatpush3.bf16.msra.mxu0 %v537_v38 }
  0x3c   :  { %507 = vmatprep.subr.bf16.mxu0 %v539_v0 }
  0x3f   :  { %508 = vmatpush3.bf16.msra.mxu0 %v538_v39 }
  0xf5   :  { %v156_v30 = vpop.f32.mrb[0].mxu0 }
  0xf6   :  { %v157_v31 = vadd.f32 %v399_v29, %v156_v30  ;;  %v471_v32 = vpop.f32.mrb[1].mxu0 }
  0xf7   :  { %v159_v33 = vpop.f32.mrb[2].mxu0 }
  0xf8   :  { %v162_v34 = vmul.f32 0.01, %v157_v31  ;;  %v472_v35 = vpop.f32.mrb[3].mxu0 }
  0xfa   :  { %v163_v36 = vmax.f32 %v157_v31, %v162_v34 }
  0xfc   :  { %v164_v37 = vpack.c.bf16 %v163_v36, %v163_v36 }
  0xfe   :  { %490 = vmatmul.mubr.bf16.vlgmr.msra.gmra.mrb[0].mxu1 %v164_v37 }
 0x1d1   :  { %v270_v41 = vpop.f32.mrb[0].mxu1 }
 0x1d2   :  { %v271_v42 = vadd.f32 %v408_v40, %v270_v41  ;;  %v491_v43 = vpop.f32.mrb[1].mxu1 }
 0x1d3   :  { %v273_v44 = vpop.f32.mrb[2].mxu1 }
 0x1d4   :  { %v276_v45 = vmul.f32 0.01, %v271_v42  ;;  %v492_v46 = vpop.f32.mrb[3].mxu1 }
 0x1d6   :  { %v277_v47 = vmax.f32 %v271_v42, %v276_v45 }
 0x1d8   :  { %v278_v48 = vpack.c.bf16 %v277_v47, %v277_v47 }
 0x1da   :  { %510 = vmatmul.mubr.bf16.vlgmr.msra.gmra.mrb[4].mxu0 %v278_v48 }
 0x2ad   :  { %v384_v50 = vpop.f32.mrb[4].mxu0 }
 0x2ae   :  { %v385_v51 = vadd.f32 %v417_v49, %v384_v50  ;;  %v511_v52 = vpop.f32.mrb[5].mxu0 }
 0x2af   :  { %v387_v53 = vpop.f32.mrb[6].mxu0 }
 0x2b0   :  { %v390_v54 = vmul.f32 0.01, %v385_v51  ;;  %v512_v55 = vpop.f32.mrb[7].mxu0 }
 0x2b2   :  { %v391_v56 = vmax.f32 %v385_v51, %v390_v54 }
 0x2b4   :  { %392 = vst [vmem:[%s723_s9] sm:$0xff] %v391_v56 }

</bundles_post_ra>
